<compile_context>
chip_gen: v7x
topology: tpu7x:2x2x1
jax: 0.10.0
libtpu: 0.0.40
codegen_flags: <defaults>
</compile_context>

<pallas_src>
import jax
import jax.numpy as jnp
from jax.experimental import pallas as pl
from jax.experimental.pallas import tpu as pltpu

NUM_FEATURES = 784
NUM_CLASSES = 10
PADDED_CLASSES = 128  # lane-dense class width for the matmul / weights


def _round_up(n, m):
    return ((n + m - 1) // m) * m


def _net_kernel(x_ref, w_ref, b_ref, o_ref):
    # x_ref: (TB, 784) f32   w_ref: (784, 128) bf16
    # b_ref: (1, 128) f32    o_ref: (TB, 10) f32
    x = x_ref[...].astype(jnp.bfloat16)           # in-kernel cast (VPU slack)
    logits = jnp.dot(x, w_ref[...],
                     preferred_element_type=jnp.float32) + b_ref[...]
    # Padded class lanes carry a -1e30 bias (W columns are zero there), so no
    # explicit mask is needed: exp underflows to exactly 0 for those lanes.
    m = jnp.max(logits, axis=-1, keepdims=True)
    e = jnp.exp(logits - m)
    denom = jnp.sum(e, axis=-1, keepdims=True)
    probs = e * pl.reciprocal(denom, approx=True)
    o_ref[...] = probs[:, :NUM_CLASSES].astype(o_ref.dtype)


def prepare_params(w, b, compute_dtype=jnp.bfloat16):
    """One-time (model-load) prep: transpose + pad W, bake class mask into b."""
    # w: (10, 784) PyTorch layout, b: (10,)
    w_t = jnp.zeros((NUM_FEATURES, PADDED_CLASSES), dtype=compute_dtype)
    w_t = w_t.at[:, :NUM_CLASSES].set(w.T.astype(compute_dtype))
    # Large finite negative (not -inf) in padded lanes: same math, no inf edge
    # cases; real lanes keep the row max finite so exp(pad) == 0 exactly.
    b_pad = jnp.full((1, PADDED_CLASSES), -1e30, dtype=jnp.float32)
    b_pad = b_pad.at[:, :NUM_CLASSES].set(b.astype(jnp.float32))
    return w_t, b_pad


def net_forward(x, w_pad, b_pad, *, block_b=2048):
    """x: (B, 1, 28, 28) f32; w_pad/b_pad from prepare_params. Returns (B, 10) f32."""
    batch = x.shape[0]
    x_flat = x.reshape(batch, NUM_FEATURES)  # torch.flatten(x, 1); stays f32

    # Batch tile: multiple of 8 sublanes; aim for >= 2 grid steps (v7x has 2
    # TensorCores and "parallel" is the only way to shard across them); cap at
    # block_b rows so double-buffered f32 x tiles fit the scoped VMEM limit.
    tb = max(8, min(block_b, _round_up(pl.cdiv(batch, 2), 8)))
    grid = (pl.cdiv(batch, tb),)  # ragged last tile is fine; no jnp.pad copy

    out = pl.pallas_call(
        _net_kernel,
        out_shape=jax.ShapeDtypeStruct((batch, NUM_CLASSES), jnp.float32),
        grid=grid,
        in_specs=[
            pl.BlockSpec((tb, NUM_FEATURES), lambda i: (i, 0)),              # x tile
            pl.BlockSpec((NUM_FEATURES, PADDED_CLASSES), lambda i: (0, 0)),  # W resident
            pl.BlockSpec((1, PADDED_CLASSES), lambda i: (0, 0)),             # bias resident
        ],
        out_specs=pl.BlockSpec((tb, NUM_CLASSES), lambda i: (i, 0)),
        compiler_params=pltpu.CompilerParams(
            dimension_semantics=("parallel",)),
    )(x_flat, w_pad, b_pad)

    return out


if __name__ == "__main__":
    key = jax.random.PRNGKey(0)
    k_x, k_w, k_b = jax.random.split(key, 3)

    # Small MNIST-like NCHW input; batch deliberately not a multiple of the
    # 8-row tile so the ragged-last-tile path is exercised.
    batch = 12
    x = jax.random.normal(k_x, (batch, 1, 28, 28), dtype=jnp.float32)

    # Linear(784, 10) parameters in PyTorch layout (out, in).
    bound = 1.0 / jnp.sqrt(784.0)
    w = jax.random.uniform(k_w, (NUM_CLASSES, NUM_FEATURES),
                           minval=-bound, maxval=bound, dtype=jnp.float32)
    b = jax.random.uniform(k_b, (NUM_CLASSES,),
                           minval=-bound, maxval=bound, dtype=jnp.float32)

    w_pad, b_pad = prepare_params(w, b)
    out = net_forward(x, w_pad, b_pad)
    out = jax.block_until_ready(out)

    # reference (pure JAX, f32) for sanity
    logits_ref = x.reshape(batch, -1) @ w.T + b
    ref = jax.nn.softmax(logits_ref, axis=-1)

    assert out.shape == (batch, NUM_CLASSES)
    assert bool(jnp.all(jnp.isfinite(out)))
    assert jnp.allclose(jnp.sum(out, axis=1), 1.0, atol=1e-2)   # approx reciprocal
    assert jnp.allclose(out, ref, atol=2e-2)                    # bf16 matmul tolerance

    print("KERNEL_OK")
</pallas_src>

<mosaic_0001>
module attributes {stable_mosaic.version = 11 : i64} {
  func.func @_net_kernel(%arg0: i32, %arg1: memref<8x784xf32, #tpu.memory_space<vmem>>, %arg2: memref<784x128xbf16, #tpu.memory_space<vmem>>, %arg3: memref<1x128xf32, #tpu.memory_space<vmem>>, %arg4: memref<8x10xf32, #tpu.memory_space<vmem>>) attributes {dimension_semantics = [#tpu.dimension_semantics<parallel>], iteration_bounds = array<i64: 2>, scalar_prefetch = 0 : i64, scratch_operands = 0 : i64, tpu.core_type = #tpu.core_type<tc>, window_params = [{transform_indices = @transform_0, window_bounds = array<i64: 8, 784>}, {pipeline_mode = #tpu.pipeline_mode<synchronous>, transform_indices = @transform_1, window_bounds = array<i64: 784, 128>}, {pipeline_mode = #tpu.pipeline_mode<synchronous>, transform_indices = @transform_2, window_bounds = array<i64: 1, 128>}, {transform_indices = @transform_3, window_bounds = array<i64: 8, 10>}]} {
    %c0 = arith.constant 0 : index
    %c0_0 = arith.constant 0 : index
    %0 = vector.load %arg1[%c0, %c0_0] : memref<8x784xf32, #tpu.memory_space<vmem>>, vector<8x784xf32>
    %1 = arith.truncf %0 : vector<8x784xf32> to vector<8x784xbf16>
    %c0_1 = arith.constant 0 : index
    %c0_2 = arith.constant 0 : index
    %2 = vector.load %arg2[%c0_1, %c0_2] : memref<784x128xbf16, #tpu.memory_space<vmem>>, vector<784x128xbf16>
    %cst = arith.constant dense<0.000000e+00> : vector<8x128xf32>
    %3 = tpu.matmul %1, %2, %cst {dimension_numbers = #tpu.dot_dimension_numbers<[1], [0], [0], [1], [0, 0, 1, 1], [], []>} : vector<8x784xbf16>, vector<784x128xbf16>, vector<8x128xf32> -> vector<8x128xf32>
    %c0_3 = arith.constant 0 : index
    %c0_4 = arith.constant 0 : index
    %4 = vector.load %arg3[%c0_3, %c0_4] : memref<1x128xf32, #tpu.memory_space<vmem>>, vector<1x128xf32>
    %5 = vector.broadcast %4 : vector<1x128xf32> to vector<8x128xf32>
    %6 = arith.addf %3, %5 : vector<8x128xf32>
    %cst_5 = arith.constant dense<0xFF800000> : vector<8xf32>
    %7 = vector.multi_reduction <maximumf>, %6, %cst_5 [1] : vector<8x128xf32> to vector<8xf32>
    %8 = vector.shape_cast %7 : vector<8xf32> to vector<8x1xf32>
    %9 = vector.broadcast %8 : vector<8x1xf32> to vector<8x128xf32>
    %10 = arith.subf %6, %9 : vector<8x128xf32>
    %11 = math.exp %10 : vector<8x128xf32>
    %cst_6 = arith.constant dense<0.000000e+00> : vector<8xf32>
    %12 = vector.multi_reduction <add>, %11, %cst_6 [1] : vector<8x128xf32> to vector<8xf32>
    %13 = vector.shape_cast %12 : vector<8xf32> to vector<8x1xf32>
    %14 = tpu.reciprocal %13 {approx = true} : vector<8x1xf32> -> vector<8x1xf32>
    %15 = vector.broadcast %14 : vector<8x1xf32> to vector<8x128xf32>
    %16 = arith.mulf %11, %15 : vector<8x128xf32>
    %17 = vector.extract_strided_slice %16 {offsets = [0, 0], sizes = [8, 10], strides = [1, 1]} : vector<8x128xf32> to vector<8x10xf32>
    %c0_7 = arith.constant 0 : index
    %c0_8 = arith.constant 0 : index
    %18 = vector.load %arg4[%c0_7, %c0_8] : memref<8x10xf32, #tpu.memory_space<vmem>>, vector<8x10xf32>
    tpu.vector_store %arg4[%c0_7, %c0_8], %17 {strides = array<i32>} : memref<8x10xf32, #tpu.memory_space<vmem>>, vector<8x10xf32>,
    return
  }
  func.func @transform_0(%arg0: i32) -> (i32, i32) {
    %c0_i32 = arith.constant 0 : i32
    %c0_i32_0 = arith.constant 0 : i32
    return %arg0, %c0_i32 : i32, i32
  }
  func.func @transform_1(%arg0: i32) -> (i32, i32) {
    %c0_i32 = arith.constant 0 : i32
    %c0_i32_0 = arith.constant 0 : i32
    %c0_i32_1 = arith.constant 0 : i32
    return %c0_i32, %c0_i32_0 : i32, i32
  }
  func.func @transform_2(%arg0: i32) -> (i32, i32) {
    %c0_i32 = arith.constant 0 : i32
    %c0_i32_0 = arith.constant 0 : i32
    %c0_i32_1 = arith.constant 0 : i32
    return %c0_i32, %c0_i32_0 : i32, i32
  }
  func.func @transform_3(%arg0: i32) -> (i32, i32) {
    %c0_i32 = arith.constant 0 : i32
    %c0_i32_0 = arith.constant 0 : i32
    return %arg0, %c0_i32 : i32, i32
  }
}

</mosaic_0001>

<bundles_post_ra>
// kernel: tpu_custom_call.1
= control target key start
LH: loop header
LB: loop body
LE: loop exit
PB: predicated region body
PF: predicated region fallthrough
CT: control target
= control target key end

     0   :  { %8 = vsyncpa [#allocation3], 0  ;;  %s1505_s0 = inlined_call_operand.hbm [shape: f32[12,784], index: 0, kind: input, shape index: {}]   ;;  %s1506_s1 = inlined_call_operand.hbm [shape: bf16[784,128], index: 1, kind: input, shape index: {}]   ;;  %s1507_s2 = inlined_call_operand.vmem [shape: f32[1,128], index: 2, kind: input, shape index: {}]   ;;  %s1508_s3 = inlined_call_operand.hbm [shape: f32[12,10], index: 3, kind: output, shape index: {}]  }
   0x1   :  { %10 = vsyncpa [#allocation3 + $0x1], 0 }
   0x2   :  { %11 = vsyncpa [#allocation6], 0 }
   0x3   :  { %12 = vsyncpa [#allocation4], 0 }
   0x4   :  { %14 = vsyncpa [#allocation4 + $0x1], 0  ;;  %s1296_s12 = smov 0   ;;  %s1298_s13 = smov 0  }
   0x5   :  { %s1300_s14 = smov 0   ;;  %s1302_s15 = smov 0  }
   0x6 LB: > { %s1317_s16 = sadd.s32 4294967295, %s1267_s15   ;;  %s885_s17 = sadd.s32 4294967294, %s1267_s15   ;;  %s1267_s15 = sphi %s1302_s15, %s1528_s15   ;;  %s1263_s14 = sphi %s1300_s14, %s1527_s14   ;;  %s1259_s13 = sphi %s1298_s13, %s1526_s13   ;;  %s1255_s12 = sphi %s1296_s12, %s1525_s12  }
   0x7   : > { %p40_p0 = scmp.ne.s32.totalorder %s1259_s13, %s1255_s12  ;;  %p1509_p1 = scmp.eq.s32.totalorder %s1317_s16, 0 }
   0x8   : > { %p112_p3 = scmp.eq.s32.totalorder %s885_s17, 1  ;;  %p886_p5 = scmp.ge.s32.totalorder %s1267_s15, 1 }
   0x9   : > { %p1326_p4 = por %p1509_p1, %p40_p0  ;;  %p119_p7 = scmp.lt.s32.totalorder %s1267_s15, 3 }
   0xa   : > { %p1331_p6 = por %p112_p3, %p40_p0  ;;  %s1269_s21 = smov [#allocation5]  }
   0xb   : > { %s1512_s18 = scalar_select %p1326_p4, 1, 0 }
   0xc   : > { %s1513_s19 = scalar_select %p1331_p6, 1, 0 }
   0xd   : > { %p1336_p8 = pnand %p886_p5, %p119_p7  ;;  %s131_s22 = sshll.u32 %s1269_s21, 4  ;;  %s1340_s22 = int_to_ptr.vmem [resolvable:$true] %s131_s22 }
   0xe   : > { %s1352_s24 = sadd.s32 1, %s1267_s15   ;;  %s27_s25 = sadd.s32 1, %s1263_s14 }
   0xf   : > { %s1514_s20 = scalar_select %p1336_p8, 1, 0 }
  0x10   : > { %p1033_p9 = pneg %p1336_p8  ;;  %s24_s26 = ssub.s32 %s1267_s15, %s1352_s24 }
  0x11   : > { %s1139_s29 = scalar_lea.hbm %s1506_s1, 6272 }
  0x12   : > { %p1347_p11 = pnand %p1033_p9, %p1509_p1  ;;  %p1140_p12 = scmp.ne.s32.totalorder %s1506_s1, %s1139_s29 }
  0x13   : > { %p1146_p5 = scmp.lt.u32.totalorder %s1139_s29, %s1506_s1 }
  0x14   : > { %p1141_p13 = pneg %p1347_p11 }
  0x16   : > { %p1142_p0 = pnand %p1141_p13, %p1140_p12 }
  0x18   : > { %p1143_p3 = pneg %p1142_p0 }
  0x1a   : > { %p1148_p7 = pnand %p1146_p5, %p1143_p3 }
  0x1c   : > { %1151 = shalt.err (!%p1148_p7)
}
  0x1d   : > { %s1152_s7 = scalar_lea.vmem %s1340_s22, 6272  ;;  %p1160_p2 = scmp.lt.s32.totalorder %s1340_s22, %s1340_s22 }
  0x1e   : > { %p1153_p9 = scmp.ne.s32.totalorder %s1340_s22, %s1152_s7  ;;  %p1161_p6 = scmp.lt.s32.totalorder %s1152_s7, %s1152_s7 }
  0x20   : > { %p1155_p10 = pnand %p1153_p9, %p1141_p13  ;;  %p1162_p4 = por %p1161_p6, %p1160_p2 }
  0x22   : > { %p1156_p1 = pneg %p1155_p10 }
  0x24   : > { %p1163_p8 = pnand %p1162_p4, %p1156_p1 }
  0x26   : > { %1166 = shalt.err (!%p1163_p8)
}
  0x27   : > { %s1270_s8 = smov 64   ;;  %s1271_s9 = smov 4  }
  0x28   : > { %1036 = dma.hbm_to_vmem [thread:$0]  (!%p1347_p11), %s1506_s1, 6272, %s1340_s22, [#allocation6], %s1270_s8, %s1270_s8, %s1271_s9  }
  0x29   : > { %p25_p2 = scmp.eq.s32.totalorder %s24_s26, 0  ;;  %p34_p1 = scmp.ne.s32.totalorder %s1263_s14, %s1259_s13 }
  0x2a   : > { %p35_p4 = scmp.eq.s32.totalorder %s1267_s15, 0  ;;  %p1046_p6 = scmp.lt.s32.totalorder %s1267_s15, 2 }
  0x2b   : > { %s1383_s17 = scalar_select %p25_p2, %s1263_s14, %s27_s25  }
  0x2c   : > { %p36_p8 = por %p35_p4, %p34_p1  ;;  %p1516_p10 = scmp.eq.s32.totalorder %s1317_s16, 1 }
  0x2d   : > { %s148_s27 = sand.u32 1, %s1263_s14   ;;  %s1023_s28 = smul.u32 896, %s1267_s15 }
  0x2e   : > { %p1387_p12 = por %p1516_p10, %p34_p1  ;;  %s1022_s29 = smul.u32 56, %s148_s27 }
  0x2f   : > { %p1393_p13 = pnand %p1046_p6, %p36_p8  ;;  %s1400_s25 = scalar_lea.hbm %s1505_s0, %s1023_s28 }
  0x30   : > { %s152_s30 = scalar_lea.vmem [#allocation2], %s1022_s29  ;;  %s149_s5 = scalar_lea.sflag [#allocation3], %s148_s27 }
  0x31   : > { %s160_s4 = sshll.u32 %s152_s30, 4  ;;  %s1167_s6 = scalar_lea.hbm %s1400_s25, 896  ;;  %s1402_s4 = int_to_ptr.vmem [resolvable:$true] %s160_s4 }
  0x32   : > { %p1168_p11 = scmp.ne.s32.totalorder %s1400_s25, %s1167_s6  ;;  %p1169_p0 = pneg %p1393_p13 }
  0x33   : > { %s1172_s9 = scalar_lea.hbm %s1505_s0, 1792  ;;  %p1173_p7 = scmp.lt.u32.totalorder %s1400_s25, %s1505_s0 }
  0x34   : > { %p1170_p3 = pnand %p1169_p0, %p1168_p11  ;;  %p1174_p9 = scmp.lt.u32.totalorder %s1172_s9, %s1167_s6 }
  0x35   : > { %p1176_p1 = scmp.lt.u32.totalorder %s1167_s6, %s1400_s25 }
  0x36   : > { %p1171_p5 = pneg %p1170_p3  ;;  %p1175_p2 = por %p1174_p9, %p1173_p7 }
  0x38   : > { %p1177_p4 = por %p1176_p1, %p1175_p2 }
  0x3a   : > { %p1178_p6 = pnand %p1177_p4, %p1171_p5 }
  0x3c   : > { %1181 = shalt.err (!%p1178_p6)
}
  0x3d   : > { %s1182_s27 = scalar_lea.vmem %s1402_s4, 896  ;;  %s1272_s28 = smov [#allocation2]  }
  0x3e   : > { %p1183_p8 = scmp.ne.s32.totalorder %s1402_s4, %s1182_s27  ;;  %s1187_s29 = sshll.u32 %s1272_s28, 4  ;;  %s1188_s29 = int_to_ptr.vmem [resolvable:$false] %s1187_s29 }
  0x3f   : > { %s1189_s22 = scalar_lea.vmem %s1188_s29, 1792  ;;  %p1190_p3 = scmp.lt.s32.totalorder %s1402_s4, %s1188_s29 }
  0x40   : > { %p1185_p10 = pnand %p1183_p8, %p1169_p0  ;;  %p1191_p7 = scmp.lt.s32.totalorder %s1189_s22, %s1182_s27 }
  0x42   : > { %p1186_p11 = pneg %p1185_p10  ;;  %p1192_p9 = por %p1191_p7, %p1190_p3 }
  0x44   : > { %p1193_p2 = pnand %p1192_p9, %p1186_p11 }
  0x46   : > { %1196 = shalt.err (!%p1193_p2)
}
  0x47   : > { %1040 = dma.hbm_to_vmem [thread:$0]  (!%p1393_p13), %s1400_s25, 896, %s1402_s4, %s149_s5  }
  0x48   : > { %p1519_p5 = scmp.ne.s32.totalorder %s1514_s20, 0 }
  0x49   : > { %s1432_s26 = sand.u32 (!%p1519_p5), 1, %s1259_s13   ;;  %p1520_p0 = scmp.ne.s32.totalorder (!%p1519_p5), %s1512_s18, 0 }
  0x4a   : > { %169 = sbr.rel (%p1519_p5) target bundleno = 695 (0x2b7), region = 32  ;;  %s172_s6 = scalar_lea.sflag (!%p1519_p5), [#allocation3], %s1432_s26 }
  0x4b   : > { %s1024_s30 = smul.u32 (!%p1519_p5), 56, %s1432_s26 }
  0x4d   : > { %s1436_s7 = scalar_lea.vmem (!%p1519_p5), [#allocation2], %s1024_s30 }
  0x51   : > { %1242 = dma.done.wait (%p1520_p0), %s172_s6, 896  }
  0x52   : > { %1244 = vsyncadd (%p1520_p0), %s172_s6, 4294966400  ;;  %p1521_p13 = scmp.eq.s32.totalorder %s1317_s16, 0 }
  0x54   : > { %1246 = dma.done.wait (%p1521_p13), [#allocation6], 6272   ;;  %p1522_p1 = pmov %p1521_p13 }
  0x55   : > { %v1086_v0 = vld [vmem:[#allocation5 + $0x40] sm:$0xff]   ;;  %v1090_v4 = vld [vmem:[#allocation5 + $0x48] sm:$0xff]   ;;  %v1094_v8 = vld [vmem:[#allocation5 + $0x50] sm:$0xff]   ;;  %v1273_v44 = vmov 0.0   ;;  %vm1274_vm0 = vmmov 0   ;;  %vm616_vm1 = vcmask 130048  }
  0x56   : > { %1248 = vsyncadd (%p1522_p1), [#allocation6], 4294961024  ;;  %v1087_v1 = vld [vmem:[#allocation5] sm:$0xff]   ;;  %948 = vmatprep.subr.bf16.mxu0 %v1086_v0  ;;  %v1091_v5 = vld [vmem:[#allocation5 + $0x8] sm:$0xff]   ;;  %s892_s23 = sshll.u32 %s1432_s26, 3  ;;  %s945_s25 = sshll.u32 %s1317_s16, 7 }
  0x57   : > { %v1088_v2 = vld [vmem:[#allocation5 + $0xc0] sm:$0xff]   ;;  %949 = vmatpush3.bf16.msra.mxu0 %v1087_v1  ;;  %v1092_v6 = vld [vmem:[#allocation5 + $0xc8] sm:$0xff]   ;;  %v1095_v9 = vld [vmem:[#allocation5 + $0x10] sm:$0xff]   ;;  %s201_s4 = scalar_lea.vmem [#allocation7], %s892_s23  ;;  %vm789_vm2 = vcmask 80896   ;;  %s1461_s10 = scalar_lea.hbm %s1508_s3, %s945_s25 }
  0x58   : > { %v1089_v3 = vld [vmem:[#allocation5 + $0x80] sm:$0xff]   ;;  %970 = vmatprep.subr.bf16.mxu1 %v1088_v2  ;;  %950 = vmatprep.subr.bf16.mxu0 %v1090_v4  ;;  %v1093_v7 = vld [vmem:[#allocation5 + $0x88] sm:$0xff]   ;;  %v1096_v10 = vld [vmem:[#allocation5 + $0xd0] sm:$0xff]   ;;  %s805_s5 = sshll.u32 %s201_s4, 4  ;;  %s792_s11 = scalar_lea.sflag [#allocation4], %s1432_s26  ;;  %s1463_s5 = int_to_ptr.vmem [resolvable:$true] %s805_s5 }
  0x59   : > { %971 = vmatpush3.bf16.msra.mxu1 %v1089_v3  ;;  %v1097_v11 = vld [vmem:[#allocation5 + $0x90] sm:$0xff]   ;;  %v1098_v12 = vld [vmem:[#allocation5 + $0x58] sm:$0xff]   ;;  %v1102_v16 = vld [vmem:[#allocation5 + $0x60] sm:$0xff]   ;;  %s1197_s27 = scalar_lea.vmem %s1463_s5, 128  ;;  %s1275_s16 = smov [#allocation7]  }
  0x5a   : > { %972 = vmatprep.subr.bf16.mxu1 %v1092_v6  ;;  %v1099_v13 = vld [vmem:[#allocation5 + $0x18] sm:$0xff]   ;;  %v1103_v17 = vld [vmem:[#allocation5 + $0x20] sm:$0xff]   ;;  %v1106_v20 = vld [vmem:[#allocation5 + $0x68] sm:$0xff]   ;;  %p1198_p4 = scmp.ne.s32.totalorder %s1463_s5, %s1197_s27  ;;  %s1201_s28 = sshll.u32 %s1275_s16, 4  ;;  %s1202_s28 = int_to_ptr.vmem [resolvable:$false] %s1201_s28 }
  0x5b   : > { %951 = vmatpush3.bf16.msra.mxu0 %v1091_v5  ;;  %v1100_v14 = vld [vmem:[#allocation5 + $0xd8] sm:$0xff]   ;;  %v1104_v18 = vld [vmem:[#allocation5 + $0xe0] sm:$0xff]   ;;  %v1107_v21 = vld [vmem:[#allocation5 + $0x28] sm:$0xff]   ;;  %s1203_s29 = scalar_lea.vmem %s1202_s28, 256  ;;  %p1204_p10 = scmp.lt.s32.totalorder %s1463_s5, %s1202_s28 }
  0x5c   : > { %952 = vmatprep.subr.bf16.mxu0 %v1094_v8  ;;  %v1101_v15 = vld [vmem:[#allocation5 + $0x98] sm:$0xff]   ;;  %v1105_v19 = vld [vmem:[#allocation5 + $0xa0] sm:$0xff]   ;;  %v1108_v22 = vld [vmem:[#allocation5 + $0xe8] sm:$0xff]   ;;  %p1199_p6 = pnand %p1198_p4, %p1387_p12  ;;  %p1205_p11 = scmp.lt.s32.totalorder %s1203_s29, %s1197_s27 }
  0x5d   : > { %973 = vmatpush3.bf16.msra.mxu1 %v1093_v7  ;;  %v1109_v23 = vld [vmem:[#allocation5 + $0xa8] sm:$0xff]   ;;  %v1110_v24 = vld [vmem:[#allocation5 + $0x70] sm:$0xff]   ;;  %v1114_v28 = vld [vmem:[#allocation5 + $0x78] sm:$0xff]  }
  0x5e   : > { %974 = vmatprep.subr.bf16.mxu1 %v1096_v10  ;;  %v1111_v25 = vld [vmem:[#allocation5 + $0x30] sm:$0xff]   ;;  %v1115_v29 = vld [vmem:[#allocation5 + $0x38] sm:$0xff]   ;;  %v1118_v36 = vld [vmem:[#allocation5 + $0x140] sm:$0xff]   ;;  %p1200_p8 = pneg %p1199_p6  ;;  %p1206_p3 = por %p1205_p11, %p1204_p10 }
  0x5f   : > { %953 = vmatpush3.bf16.msra.mxu0 %v1095_v9  ;;  %v1112_v26 = vld [vmem:[#allocation5 + $0xf0] sm:$0xff]   ;;  %v1116_v30 = vld [vmem:[#allocation5 + $0xf8] sm:$0xff]   ;;  %v206_v37 = vld [vmem:[%s1436_s7 + $0x18] sm:$0xff] }
  0x60   : > { %954 = vmatprep.subr.bf16.mxu0 %v1098_v12  ;;  %v1113_v27 = vld [vmem:[#allocation5 + $0xb0] sm:$0xff]   ;;  %v1117_v33 = vld [vmem:[#allocation5 + $0xb8] sm:$0xff]   ;;  %v213_v38 = vpack.c.bf16 %v206_v37, %v206_v37  ;;  %v1119_v39 = vld [vmem:[#allocation5 + $0x100] sm:$0xff]   ;;  %p1207_p7 = pnand %p1206_p3, %p1200_p8 }
  0x61   : > { %975 = vmatpush3.bf16.msra.mxu1 %v1097_v11  ;;  %v204_v31 = vld [vmem:[%s1436_s7 + $0x8] sm:$0xff]  ;;  %v203_v34 = vld [vmem:[%s1436_s7] sm:$0xff]  ;;  %v205_v40 = vld [vmem:[%s1436_s7 + $0x10] sm:$0xff] }
  0x62   : > { %976 = vmatprep.subr.bf16.mxu1 %v1100_v14  ;;  %v211_v32 = vpack.c.bf16 %v204_v31, %v204_v31  ;;  %v210_v35 = vpack.c.bf16 %v203_v34, %v203_v34  ;;  %692 = vmatprep.mubr.bf16.mxu1 %v213_v38  ;;  %v212_v41 = vpack.c.bf16 %v205_v40, %v205_v40  ;;  %v1120_v42 = vld [vmem:[#allocation5 + $0x148] sm:$0xff]   ;;  %v1122_v45 = vld [vmem:[#allocation5 + $0x150] sm:$0xff]   ;;  %v1124_v47 = vld [vmem:[#allocation5 + $0x158] sm:$0xff]  }
  0x63   : > { %955 = vmatpush3.bf16.msra.mxu0 %v1099_v13  ;;  %v1121_v43 = vld [vmem:[#allocation5 + $0x108] sm:$0xff]   ;;  %v1123_v46 = vld [vmem:[#allocation5 + $0x110] sm:$0xff]   ;;  %v1125_v48 = vld [vmem:[#allocation5 + $0x118] sm:$0xff]  }
  0x64   : > { %956 = vmatprep.subr.bf16.mxu0 %v1102_v16  ;;  %652 = vmatprep.mubr.bf16.mxu0 %v211_v32  ;;  %v1126_v49 = vld [vmem:[#allocation5 + $0x160] sm:$0xff]   ;;  %v1128_v51 = vld [vmem:[#allocation5 + $0x168] sm:$0xff]   ;;  %v208_v53 = vld [vmem:[%s1436_s7 + $0x28] sm:$0xff] }
  0x65   : > { %977 = vmatpush3.bf16.msra.mxu1 %v1101_v15  ;;  %v1127_v50 = vld [vmem:[#allocation5 + $0x120] sm:$0xff]   ;;  %v215_v54 = vpack.c.bf16 %v208_v53, %v208_v53  ;;  %v1129_v56 = vld [vmem:[#allocation5 + $0x128] sm:$0xff]   ;;  %v1130_v58 = vld [vmem:[#allocation5 + $0x170] sm:$0xff]  }
  0x66   : > { %978 = vmatprep.subr.bf16.mxu1 %v1104_v18  ;;  %v1134_v52 = vld [vmem:[#allocation5 + $0x180] sm:$0xff]   ;;  %v1131_v59 = vld [vmem:[#allocation5 + $0x130] sm:$0xff]   ;;  %v1132_v60 = vld [vmem:[#allocation5 + $0x178] sm:$0xff]  }
  0x67   : > { %957 = vmatpush3.bf16.msra.mxu0 %v1103_v17  ;;  %v209_v55 = vld [vmem:[%s1436_s7 + $0x30] sm:$0xff]  ;;  %v207_v62 = vld [vmem:[%s1436_s7 + $0x20] sm:$0xff] }
  0x68   : > { %958 = vmatprep.subr.bf16.mxu0 %v1106_v20  ;;  %v216_v57 = vpack.c.bf16 %v209_v55, %v209_v55  ;;  %v1133_v61 = vld [vmem:[#allocation5 + $0x138] sm:$0xff]   ;;  %v214_v63 = vpack.c.bf16 %v207_v62, %v207_v62  ;;  %v893_v1 = vld [vmem:[%s1507_s2] ss:$0 sm:$0xff] }
  0x69   : > { %979 = vmatpush3.bf16.msra.mxu1 %v1105_v19 }
  0x6a   : > { %980 = vmatprep.subr.bf16.mxu1 %v1108_v22 }
  0x6b   : > { %959 = vmatpush3.bf16.msra.mxu0 %v1107_v21 }
  0x6c   : > { %960 = vmatprep.subr.bf16.mxu0 %v1110_v24 }
  0x6d   : > { %981 = vmatpush3.bf16.msra.mxu1 %v1109_v23 }
  0x6e   : > { %982 = vmatprep.subr.bf16.mxu1 %v1112_v26 }
  0x6f   : > { %961 = vmatpush3.bf16.msra.mxu0 %v1111_v25 }
  0x70   : > { %962 = vmatprep.subr.bf16.mxu0 %v1114_v28 }
  0x71   : > { %983 = vmatpush3.bf16.msra.mxu1 %v1113_v27 }
  0x72   : > { %984 = vmatprep.subr.bf16.mxu1 %v1116_v30 }
  0x73   : > { %963 = vmatpush3.bf16.msra.mxu0 %v1115_v29 }
  0x74   : > { %992 = vmatprep.subr.bf16.mxu0 %v1118_v36 }
  0x75   : > { %985 = vmatpush3.bf16.msra.mxu1 %v1117_v33 }
  0x76   : > { %653 = vmatmul.mubr.bf16.vlgmr.msra.gmra.mrb[0].mxu0 %v210_v35  ;;  %1016 = vmatprep.subr.bf16.mxu1 %v1273_v44 }
  0x77   : > { %993 = vmatpush3.bf16.msra.mxu0 %v1119_v39  ;;  %732 = vmatprep.mubr.bf16.mxu0 %v215_v54 }
  0x78   : > { %693 = vmatmul.mubr.bf16.vlgmr.msra.gmra.mrb[0].mxu1 %v212_v41  ;;  %994 = vmatprep.subr.bf16.mxu0 %v1120_v42 }
  0x79   : > { %1018 = vmatprep.mubr.msk.bf16.mxu1 %vm1274_vm0, %v1273_v44  ;;  %1017 = vmatpush3.bf16.msra.mxu1 %v1134_v52 }
  0x7b   : > { %995 = vmatpush3.bf16.msra.mxu0 %v1121_v43 }
  0x7c   : > { %996 = vmatprep.subr.bf16.mxu0 %v1122_v45 }
  0x7f   : > { %997 = vmatpush3.bf16.msra.mxu0 %v1123_v46 }
  0x80   : > { %998 = vmatprep.subr.bf16.mxu0 %v1124_v47  ;;  %1019 = vmatmul.mubr.msk.bf16.vlgmr.msra.gmra.mrb[4].mxu1 %vm616_vm1, %v216_v57 }
  0x83   : > { %999 = vmatpush3.bf16.msra.mxu0 %v1125_v48 }
  0x84   : > { %1000 = vmatprep.subr.bf16.mxu0 %v1126_v49 }
  0x87   : > { %1001 = vmatpush3.bf16.msra.mxu0 %v1127_v50 }
  0x88   : > { %1002 = vmatprep.subr.bf16.mxu0 %v1128_v51 }
  0x8b   : > { %1003 = vmatpush3.bf16.msra.mxu0 %v1129_v56 }
  0x8c   : > { %1004 = vmatprep.subr.bf16.mxu0 %v1130_v58 }
  0x8f   : > { %1005 = vmatpush3.bf16.msra.mxu0 %v1131_v59 }
  0x90   : > { %1006 = vmatprep.subr.bf16.mxu0 %v1132_v60 }
  0x93   : > { %1007 = vmatpush3.bf16.msra.mxu0 %v1133_v61 }
  0x96   : > { %733 = vmatmul.mubr.bf16.vlgmr.msra.gmra.mrb[4].mxu0 %v214_v63 }
 0x149   : > { %v964_v0 = vpop.f32.mrb[0].mxu0 }
 0x14a   : > { %v965_v2 = vpop.f32.mrb[1].mxu0 }
 0x14b   : > { %v966_v3 = vadd.f32 %v965_v2, %v964_v0  ;;  %v967_v4 = vpop.f32.mrb[2].mxu0  ;;  %v986_v5 = vpop.f32.mrb[0].mxu1 }
 0x14c   : > { %v968_v6 = vpop.f32.mrb[3].mxu0  ;;  %v987_v8 = vpop.f32.mrb[1].mxu1 }
 0x14d   : > { %v655_v7 = vadd.f32 %v966_v3, %v893_v1  ;;  %v988_v9 = vadd.f32 %v987_v8, %v986_v5  ;;  %v989_v10 = vpop.f32.mrb[2].mxu1 }
 0x14e   : > { %v990_v11 = vpop.f32.mrb[3].mxu1 }
 0x14f   : > { %v695_v12 = vadd.f32 %v988_v9, %v655_v7 }
 0x153   : > { %v774_v13 = vpop.f32.mrb[4].mxu1 }
 0x154   : > { %v1020_v14 = vpop.f32.mrb[5].mxu1 }
 0x155   : > { %v777_v15 = vpop.f32.mrb[6].mxu1 }
 0x156   : > { %v1021_v16 = vpop.f32.mrb[7].mxu1 }
 0x169   : > { %v1008_v17 = vpop.f32.mrb[4].mxu0 }
 0x16a   : > { %v1009_v18 = vpop.f32.mrb[5].mxu0 }
 0x16b   : > { %v1010_v19 = vadd.f32 %v1009_v18, %v1008_v17  ;;  %v1011_v20 = vpop.f32.mrb[6].mxu0 }
 0x16c   : > { %v1012_v21 = vpop.f32.mrb[7].mxu0 }
 0x16d   : > { %v735_v22 = vadd.f32 %v1010_v19, %v695_v12 }
 0x16f   : > { %v775_v23 = vadd.f32 %v774_v13, %v735_v22 }
 0x171   : > { %780 = vmax.xlane.f32.xlu0 %v775_v23 }
 0x1fe   : > { %v781_v24 = vpop.xlane.xlu0 %780 }
 0x1ff   : > { %v782_v25 = vsub.f32 %v775_v23, %v781_v24 }
 0x201   : > { %v783_v26 = vmul.f32 1.442695, %v782_v25 }
 0x203   : > { %1135 = vpow2.f32 %v783_v26 }
 0x20d   : > { %v1136_v27 = vpop.eup %1135 }
 0x20e   : > { %785 = vadd.xlane.f32.xlu0 %v1136_v27 }
 0x29b   : > { %v786_v28 = vpop.xlane.xlu0 %785 }
 0x29c   : > { %1137 = vrcp.f32 %v786_v28 }
 0x2a6   : > { %v1138_v29 = vpop.eup %1137 }
 0x2a7   : > { %v788_v30 = vmul.f32 %v1138_v29, %v1136_v27 }
 0x2a9   : > { %790 = vst.msk [vmem:[%s201_s4] sm:$0xff] %vm789_vm2, %v788_v30 }
 0x2aa   : > { %1210 = shalt.err (!%p1207_p7)
}
 0x2ab   : > { %s1211_s22 = scalar_lea.hbm %s1461_s10, 128  ;;  %s1215_s6 = scalar_lea.hbm %s1508_s3, 256 }
 0x2ac   : > { %p1212_p9 = scmp.ne.s32.totalorder %s1461_s10, %s1211_s22  ;;  %p1216_p0 = scmp.lt.u32.totalorder %s1461_s10, %s1508_s3 }
 0x2ad   : > { %p1217_p13 = scmp.lt.u32.totalorder %s1215_s6, %s1211_s22  ;;  %p1219_p4 = scmp.lt.u32.totalorder %s1211_s22, %s1461_s10 }
 0x2ae   : > { %p1213_p2 = pnand %p1212_p9, %p1387_p12 }
 0x2af   : > { %p1218_p1 = por %p1217_p13, %p1216_p0 }
 0x2b0   : > { %p1214_p5 = pneg %p1213_p2 }
 0x2b1   : > { %p1220_p6 = por %p1219_p4, %p1218_p1 }
 0x2b3   : > { %p1221_p8 = pnand %p1220_p6, %p1214_p5 }
 0x2b5   : > { %1224 = shalt.err (!%p1221_p8)
}
 0x2b6   : > { %1031 = dma.vmem_to_hbm [thread:$0]  (%p1387_p12), %s1463_s5, 128, %s1461_s10, %s792_s11  }
 0x2b7 PF: > { %s817_s20 = sand.u32 1, %s1255_s12   ;;  %p1523_p10 = scmp.ne.s32.totalorder %s1513_s19, 0 }
 0x2b8   : > { %p1524_p11 = scmp.ge.s32.totalorder %s1267_s15, 2  ;;  %s818_s23 = scalar_lea.sflag [#allocation4], %s817_s20 }
 0x2ba   : > { %p1042_p3 = pnand %p1524_p11, %p1523_p10 }
 0x2bc   : > { %1250 = dma.done.wait (!%p1042_p3), %s818_s23, 128  }
 0x2bd   : > { %1252 = vsyncadd (!%p1042_p3), %s818_s23, 4294967168  ;;  %p17_p7 = scmp.ge.s32.totalorder %s1352_s24, 4   ;;  %s1525_s12 = smov %s1259_s13 }
 0x2be   : > { %s1526_s13 = smov %s1263_s14  ;;  %s1527_s14 = smov %s1383_s17 }
 0x2bf   : > { %s1528_s15 = smov %s1352_s24  ;;  %19 = sbr.rel (!%p17_p7) target bundleno = 6 (0x6), region = 81 }
 0x2c6   :  { %823 = vsyncpa [#allocation3], 1 }
 0x2c7   :  { %825 = vsyncpa [#allocation3 + $0x1], 1 }
 0x2c8   :  { %826 = vsyncpa [#allocation6], 1 }
 0x2c9   :  { %827 = vsyncpa [#allocation4], 1 }
 0x2ca   :  { %829 = vsyncpa [#allocation4 + $0x1], 1 }

</bundles_post_ra>
